<compile_context>
chip_gen: v5e
topology: v5e:2x2
jax: 0.10.0
libtpu: 0.0.40
codegen_flags: <defaults>
</compile_context>

<pallas_src>
import math

import jax
import jax.numpy as jnp
from jax.experimental import pallas as pl
from jax.experimental.pallas import tpu as pltpu


def _tanh_like_kernel(x_ref, alpha_ref, beta_ref, o_ref):
    # Single upcast to f32, compute, downcast on store.
    x = x_ref[...].astype(jnp.float32)        # (tile_b, tile_n)
    a = alpha_ref[...].astype(jnp.float32)    # (1, tile_n) -> broadcasts over rows
    b = beta_ref[...].astype(jnp.float32)     # (1, tile_n)
    xb = x * b
    # rsqrt lowers to the EUP (its own VLIW slot) -> no VALU divide/sqrt.
    o_ref[...] = (a * x * jax.lax.rsqrt(1.0 + xb * xb)).astype(o_ref.dtype)


def _pack_factor(B, N):
    """Smallest f such that (N*f) % 128 == 0 and f divides B; 1 if none / N>=128."""
    if N >= 128 or B <= 0:
        return 1
    base = 128 // math.gcd(N, 128)
    f = base
    while f <= min(B, 1024):
        if B % f == 0:
            return f
        f += base
    return 1


def tanh_like(x, alpha, beta, *, target_tile_bytes=4 << 20, max_lane_tile=2048):
    """x: (B, N); alpha, beta: (1, N). Returns (B, N) = alpha*x/sqrt(1+(x*beta)^2)."""
    B, N = x.shape
    dtype = x.dtype
    itemsize = jnp.dtype(dtype).itemsize
    sublane = max(8, 32 // itemsize)          # 8 for f32, 16 for bf16, 32 for int8

    # ---- lane-dense packing: fold f batch rows into the lane axis.
    #      Only done when f | B, so the reshape is a free bitcast (no pad/slice). ----
    f = _pack_factor(B, N)
    rows, Np = B // f, N * f
    x2 = x.reshape(rows, Np) if f > 1 else x
    a2 = jnp.tile(alpha, (1, f)) if f > 1 else alpha   # preserves PyTorch broadcast
    b2 = jnp.tile(beta, (1, f)) if f > 1 else beta

    # ---- lane tiling: bound per-tile width so huge N never blows VMEM (v7x: 64 MiB) ----
    if Np > max_lane_tile:
        tile_n = (max_lane_tile // 128) * 128
    else:
        tile_n = Np
    grid_n = pl.cdiv(Np, tile_n)

    # ---- row tiling: ~target_tile_bytes of input per tile, sublane-aligned ----
    max_rows = max(1, target_tile_bytes // (tile_n * itemsize))
    tile_b = min(rows, max_rows)
    if tile_b < rows:
        tile_b = max(sublane, (tile_b // sublane) * sublane)
        tile_b = min(tile_b, rows)
    grid_b = pl.cdiv(rows, tile_b)

    # ---- keep at least 2 grid steps when possible so both v7x TCs get work ----
    if grid_b == 1 and grid_n == 1 and rows >= 2 * sublane:
        half = -(-rows // 2)
        tile_b = ((half + sublane - 1) // sublane) * sublane
        tile_b = min(tile_b, rows)
        grid_b = pl.cdiv(rows, tile_b)

    # ---- explicit VMEM budget: in+out tiles, double-buffered, + params + headroom.
    #      (v5e default scoped limit is only 16 MiB; don't rely on it.) ----
    tile_bytes = tile_b * tile_n * itemsize
    vmem_limit = int(min(max(4 * tile_bytes + (4 << 20), 24 << 20), 48 << 20))

    out2 = pl.pallas_call(
        _tanh_like_kernel,
        out_shape=jax.ShapeDtypeStruct((rows, Np), dtype),
        grid_spec=pltpu.PrefetchScalarGridSpec(
            num_scalar_prefetch=0,
            grid=(grid_b, grid_n),
            in_specs=[
                pl.BlockSpec((tile_b, tile_n), lambda i, j: (i, j)),   # x tile
                pl.BlockSpec((1, tile_n), lambda i, j: (0, j)),        # alpha
                pl.BlockSpec((1, tile_n), lambda i, j: (0, j)),        # beta
            ],
            out_specs=pl.BlockSpec((tile_b, tile_n), lambda i, j: (i, j)),
        ),
        compiler_params=pltpu.CompilerParams(
            dimension_semantics=("parallel", "parallel"),
            vmem_limit_bytes=vmem_limit,
        ),
    )(x2, a2, b2)

    return out2.reshape(B, N) if f > 1 else out2


def make_params(neuron1, neuron, dtype=jnp.float32):
    """Deterministic init, identical to the PyTorch __init__."""
    alpha = jnp.ones((1, neuron), dtype) / jnp.sqrt(jnp.asarray(float(neuron1), dtype))
    beta = jnp.ones((1, neuron), dtype) / float(neuron1)
    return alpha, beta


def _ref(x, alpha, beta):
    return alpha * x / jnp.sqrt(1.0 + jnp.square(x * beta))


if __name__ == "__main__":
    key = jax.random.PRNGKey(0)

    # Case 1: the module's natural small shape (packed path: N=32 -> f=4, lanes=128).
    neuron1, neuron, batch = 64, 32, 8
    k1, k2, k3 = jax.random.split(key, 3)
    x = jax.random.normal(k1, (batch, neuron), dtype=jnp.float32)
    alpha, beta = make_params(neuron1, neuron)
    out = jax.block_until_ready(tanh_like(x, alpha, beta))
    assert out.shape == (batch, neuron)
    assert jnp.allclose(out, _ref(x, alpha, beta), atol=1e-5, rtol=1e-5)

    # Case 2: B not divisible by any valid pack factor -> unpacked fallback (no pad copies).
    x2 = jax.random.normal(k2, (7, 48), dtype=jnp.float32)
    a2, b2 = make_params(96, 48)
    out2 = jax.block_until_ready(tanh_like(x2, a2, b2))
    assert jnp.allclose(out2, _ref(x2, a2, b2), atol=1e-5, rtol=1e-5)

    # Case 3: N >= 128 (no packing), multiple row blocks exercised.
    x3 = jax.random.normal(k3, (40, 256), dtype=jnp.float32)
    a3, b3 = make_params(128, 256)
    out3 = jax.block_until_ready(tanh_like(x3, a3, b3, target_tile_bytes=8 << 10))
    assert jnp.allclose(out3, _ref(x3, a3, b3), atol=1e-5, rtol=1e-5)

    print("KERNEL_OK")
</pallas_src>

<mosaic_0001>
module attributes {stable_mosaic.version = 11 : i64} {
  func.func @_tanh_like_kernel(%arg0: i32, %arg1: i32, %arg2: memref<2x128xf32, #tpu.memory_space<vmem>>, %arg3: memref<1x128xf32, #tpu.memory_space<vmem>>, %arg4: memref<1x128xf32, #tpu.memory_space<vmem>>, %arg5: memref<2x128xf32, #tpu.memory_space<vmem>>) attributes {dimension_semantics = [#tpu.dimension_semantics<parallel>, #tpu.dimension_semantics<parallel>], iteration_bounds = array<i64: 1, 1>, scalar_prefetch = 0 : i64, scratch_operands = 0 : i64, tpu.core_type = #tpu.core_type<tc>, window_params = [{transform_indices = @transform_0, window_bounds = array<i64: 2, 128>}, {transform_indices = @transform_1, window_bounds = array<i64: 1, 128>}, {transform_indices = @transform_2, window_bounds = array<i64: 1, 128>}, {transform_indices = @transform_3, window_bounds = array<i64: 2, 128>}]} {
    %c0 = arith.constant 0 : index
    %c0_0 = arith.constant 0 : index
    %0 = vector.load %arg2[%c0, %c0_0] : memref<2x128xf32, #tpu.memory_space<vmem>>, vector<2x128xf32>
    %c0_1 = arith.constant 0 : index
    %c0_2 = arith.constant 0 : index
    %1 = vector.load %arg3[%c0_1, %c0_2] : memref<1x128xf32, #tpu.memory_space<vmem>>, vector<1x128xf32>
    %c0_3 = arith.constant 0 : index
    %c0_4 = arith.constant 0 : index
    %2 = vector.load %arg4[%c0_3, %c0_4] : memref<1x128xf32, #tpu.memory_space<vmem>>, vector<1x128xf32>
    %3 = vector.broadcast %2 : vector<1x128xf32> to vector<2x128xf32>
    %4 = arith.mulf %0, %3 : vector<2x128xf32>
    %5 = vector.broadcast %1 : vector<1x128xf32> to vector<2x128xf32>
    %6 = arith.mulf %5, %0 : vector<2x128xf32>
    %7 = arith.mulf %4, %4 : vector<2x128xf32>
    %cst = arith.constant 1.000000e+00 : f32
    %8 = vector.broadcast %cst : f32 to vector<2x128xf32>
    %9 = arith.addf %8, %7 : vector<2x128xf32>
    %10 = math.rsqrt %9 : vector<2x128xf32>
    %11 = arith.mulf %6, %10 : vector<2x128xf32>
    %c0_5 = arith.constant 0 : index
    %c0_6 = arith.constant 0 : index
    %12 = vector.load %arg5[%c0_5, %c0_6] : memref<2x128xf32, #tpu.memory_space<vmem>>, vector<2x128xf32>
    tpu.vector_store %arg5[%c0_5, %c0_6], %11 {strides = array<i32>} : memref<2x128xf32, #tpu.memory_space<vmem>>, vector<2x128xf32>,
    return
  }
  func.func @transform_0(%arg0: i32, %arg1: i32) -> (i32, i32) {
    %c0_i32 = arith.constant 0 : i32
    return %arg0, %arg1 : i32, i32
  }
  func.func @transform_1(%arg0: i32, %arg1: i32) -> (i32, i32) {
    %c0_i32 = arith.constant 0 : i32
    %c0_i32_0 = arith.constant 0 : i32
    return %c0_i32, %arg1 : i32, i32
  }
  func.func @transform_2(%arg0: i32, %arg1: i32) -> (i32, i32) {
    %c0_i32 = arith.constant 0 : i32
    %c0_i32_0 = arith.constant 0 : i32
    return %c0_i32, %arg1 : i32, i32
  }
  func.func @transform_3(%arg0: i32, %arg1: i32) -> (i32, i32) {
    %c0_i32 = arith.constant 0 : i32
    return %arg0, %arg1 : i32, i32
  }
}

</mosaic_0001>

<bundles_post_ra>
// kernel: tpu_custom_call.1
= control target key start
LH: loop header
LB: loop body
LE: loop exit
PB: predicated region body
PF: predicated region fallthrough
CT: control target
= control target key end

     0   :  { %8 = vsyncpa [#allocation3], 0  ;;  %s206_s0 = inlined_call_operand.hbm [shape: f32[2,128], index: 0, kind: input, shape index: {}]   ;;  %s207_s1 = inlined_call_operand.hbm [shape: f32[1,128], index: 1, kind: input, shape index: {}]   ;;  %s208_s2 = inlined_call_operand.vmem [shape: f32[1,128], index: 2, kind: input, shape index: {}]   ;;  %s209_s3 = inlined_call_operand.hbm [shape: f32[2,128], index: 3, kind: output, shape index: {}]  }
   0x1   :  { %9 = vsyncpa [#allocation6], 0 }
   0x2   :  { %10 = vsyncpa [#allocation4], 0  ;;  %s16_s14 = sshll.u32 %s206_s0, 4  ;;  %s171_s15 = smov [#allocation2]   ;;  %s17_s14 = int_to_ptr.hbm [resolvable:$true] %s16_s14 }
   0x3   :  { %s18_s16 = sshll.u32 %s171_s15, 4  ;;  %s27_s19 = sshll.u32 %s207_s1, 4  ;;  %s19_s16 = int_to_ptr.vmem [resolvable:$true] %s18_s16  ;;  %s28_s19 = int_to_ptr.hbm [resolvable:$true] %s27_s19 }
   0x4   :  { %21 = dma.hbm_to_vmem [thread:$0]  %s17_s14, 32, %s19_s16, [#allocation3]  }
   0x5   :  { %s172_s20 = smov [#allocation5]  }
   0x6   :  { %s29_s21 = sshll.u32 %s172_s20, 4  ;;  %s30_s21 = int_to_ptr.vmem [resolvable:$true] %s29_s21 }
   0x7   :  { %32 = dma.hbm_to_vmem [thread:$0]  %s28_s19, 16, %s30_s21, [#allocation6]  }
   0x8   :  { %165 = dma.done.wait [#allocation3], 32  }
   0x9   :  { %166 = vsyncadd [#allocation3], 4294967264 }
   0xa   :  { %167 = dma.done.wait [#allocation6], 16  }
   0xb   :  { %168 = vsyncadd [#allocation6], 4294967280  ;;  %v43_v0 = vld [vmem:[#allocation2] sm:$0x3]  ;;  %v90_v8 = vld [vmem:[#allocation5] ss:$0 sm:$0xff] }
   0xc   :  { %v89_v1 = vld [vmem:[%s208_s2] ss:$0 sm:$0xff]  ;;  %v53_v11 = vmul.f32 %v90_v8, %v43_v0  ;;  %s173_s1 = smov [#allocation7]   ;;  %s75_s2 = sshll.u32 %s209_s3, 4  ;;  %s76_s2 = int_to_ptr.hbm [resolvable:$true] %s75_s2 }
   0xd   :  { %v49_v2 = vmul.f32 %v89_v1, %v43_v0  ;;  %s73_s23 = sshll.u32 %s173_s1, 4  ;;  %s74_s23 = int_to_ptr.vmem [resolvable:$true] %s73_s23 }
   0xf   :  { %v54_v3 = vmul.f32 %v49_v2, %v49_v2 }
  0x11   :  { %v55_v4 = vadd.f32 1.0, %v54_v3 }
  0x13   :  { %91 = vrsqrt.f32 %v55_v4  ;;  %vm62_vm0 = vweird.f32 %v55_v4 }
  0x19   :  { %v92_v5 = vpop.eup %91 }
  0x1a   :  { %v57_v6 = vmul.f32 %v92_v5, %v55_v4  ;;  %vm63_vm1 = vweird.f32 %v92_v5 }
  0x1b   :  { %vm64_vm2 = vmor %vm62_vm0, %vm63_vm1 }
  0x1c   :  { %v58_v7 = vmul.f32 %v92_v5, %v57_v6 }
  0x1e   :  { %v59_v9 = vmul.f32 0.5, %v58_v7 }
  0x20   :  { %v60_v10 = vsub.f32 1.5, %v59_v9 }
  0x22   :  { %v61_v12 = vmul.f32 %v92_v5, %v60_v10 }
  0x24   :  { %v65_v13 = vsel %vm64_vm2, %v92_v5, %v61_v12 }
  0x25   :  { %v66_v14 = vmul.f32 %v65_v13, %v53_v11 }
  0x27   :  { %67 = vst [vmem:[#allocation7] sm:$0x3] %v66_v14 }
  0x28   :  { %78 = dma.vmem_to_hbm [thread:$0]  %s74_s23, 32, %s76_s2, [#allocation4]  }
  0x29   :  { %169 = dma.done.wait [#allocation4], 32  }
  0x2a   :  { %170 = vsyncadd [#allocation4], 4294967264 }
  0x2b   :  { %83 = vsyncpa [#allocation3], 1 }
  0x2c   :  { %84 = vsyncpa [#allocation6], 1 }
  0x2d   :  { %85 = vsyncpa [#allocation4], 1 }

</bundles_post_ra>
